<compile_context>
chip_gen: v5e
topology: v5e:2x2
jax: 0.10.0
libtpu: 0.0.40
codegen_flags: <defaults>
</compile_context>

<pallas_src>
import math
import functools

import numpy as np
import jax
import jax.numpy as jnp
from jax import lax
from jax.experimental import pallas as pl
from jax.experimental.pallas import tpu as pltpu


# ----------------------------------------------------------------------------
# generation-aware VMEM sizing
# ----------------------------------------------------------------------------
def _vmem_capacity_bytes():
    try:
        return int(pltpu.get_tpu_info().vmem_capacity_bytes)
    except Exception:
        return 64 * 1024 * 1024          # conservative default (v7x per-TensorCore)


def _vmem_limit_bytes(frac=0.55):
    cap = _vmem_capacity_bytes()
    return max(32 * 1024 * 1024, min(int(cap * frac), 100 * 1024 * 1024))


# ----------------------------------------------------------------------------
# tiling helpers
# ----------------------------------------------------------------------------
def _pick_tile(dim, pref, align):
    """Largest tile <= pref that divides `dim` and is a multiple of `align`;
    falls back to the full dim (always a legal BlockSpec block)."""
    t = min(pref, dim)
    t = (t // align) * align
    while t >= align:
        if dim % t == 0:
            return t
        t -= align
    return dim


def _pick_sdpa_blocks(num_bh, t_len, s_len, hd, *, in_bytes, out_bytes, cbytes,
                      max_unroll=32):
    """Choose (head_block HB, t_block tT) for the SDPA grid.

    HB must divide num_bh and give a lane-dense block (HB*hd % 128 == 0) unless it
    is the whole merged batch*head axis."""
    budget = int(_vmem_limit_bytes() * 0.6)
    tT = _pick_tile(t_len, 256, 8)

    cands = [hb for hb in range(1, num_bh + 1)
             if num_bh % hb == 0 and ((hb * hd) % 128 == 0 or hb == num_bh)]

    def step_bytes(hb):
        lane = hb * hd
        qo = 2 * tT * lane * (in_bytes + out_bytes)     # double-buffered q + o blocks
        kv = 2 * 2 * s_len * lane * in_bytes            # double-buffered k, v blocks
        tmp = (tT + 2 * s_len) * lane * cbytes          # casted q/k/v working copies
        tmp += 3 * tT * s_len * 4                       # per-head f32 scores/probs temps
        tmp += 2 * tT * lane * 4                        # f32 per-head outputs before store
        return qo + kv + tmp

    good = [hb for hb in cands if hb <= max_unroll and step_bytes(hb) <= budget]
    # Prefer a grid with >= 2 steps so both v7x TensorCores get sharded work.
    multi = [hb for hb in good if (num_bh // hb) * (t_len // tT) >= 2]
    if multi:
        return max(multi), tT
    if good:
        return max(good), tT
    # TODO(synk): fall back to an S-tiled (flash-style) path instead of only shrinking HB.
    return min(cands), tT


# ----------------------------------------------------------------------------
# Tiled linear:  y = x @ w_t + b        (w_t pre-transposed to (K, Nout))
# ----------------------------------------------------------------------------
def _linear_kernel(x_ref, w_ref, b_ref, o_ref, acc_ref, *, compute_dtype):
    @pl.when(pl.program_id(2) == 0)
    def _():
        acc_ref[...] = jnp.zeros_like(acc_ref)

    acc_ref[...] += jnp.dot(x_ref[...].astype(compute_dtype),
                            w_ref[...].astype(compute_dtype),
                            preferred_element_type=jnp.float32)

    @pl.when(pl.program_id(2) == pl.num_programs(2) - 1)
    def _():
        o_ref[...] = (acc_ref[...] + b_ref[...].astype(jnp.float32)).astype(o_ref.dtype)


def pallas_linear(x, w_t, b, *, out_dtype=None, compute_dtype=jnp.bfloat16,
                  tm=512, tn=512, tk=None):
    """x: (M, K); w_t: (K, Nout); b: (Nout,). Returns (M, Nout) in out_dtype."""
    M, K = x.shape
    Nout = w_t.shape[1]
    out_dtype = out_dtype or x.dtype
    if tk is None:
        tk = 1024 if np.dtype(compute_dtype).itemsize < 4 else 512
    tm = _pick_tile(M, tm, 8)
    tn = _pick_tile(Nout, tn, 128)
    tk = _pick_tile(K, tk, 128)
    grid = (M // tm, Nout // tn, K // tk)
    kern = functools.partial(_linear_kernel, compute_dtype=compute_dtype)
    return pl.pallas_call(
        kern,
        out_shape=jax.ShapeDtypeStruct((M, Nout), out_dtype),
        grid=grid,
        in_specs=[
            pl.BlockSpec((tm, tk), lambda i, j, k: (i, k)),
            pl.BlockSpec((tk, tn), lambda i, j, k: (k, j)),
            pl.BlockSpec((1, tn), lambda i, j, k: (0, j)),
        ],
        out_specs=pl.BlockSpec((tm, tn), lambda i, j, k: (i, j)),
        scratch_shapes=[pltpu.VMEM((tm, tn), jnp.float32)],
        compiler_params=pltpu.CompilerParams(
            dimension_semantics=("parallel", "parallel", "arbitrary"),
            vmem_limit_bytes=_vmem_limit_bytes()),
    )(x, w_t, b.reshape(1, Nout))


# ----------------------------------------------------------------------------
# Fused K/V in-projection: one read of each `source` tile feeds both matmuls.
# ----------------------------------------------------------------------------
def _kv_linear_kernel(x_ref, wk_ref, wv_ref, bk_ref, bv_ref, k_ref, v_ref,
                      acck_ref, accv_ref, *, compute_dtype):
    kk = pl.program_id(2)

    @pl.when(kk == 0)
    def _():
        acck_ref[...] = jnp.zeros_like(acck_ref)
        accv_ref[...] = jnp.zeros_like(accv_ref)

    x = x_ref[...].astype(compute_dtype)        # read source tile ONCE for K and V
    acck_ref[...] += jnp.dot(x, wk_ref[...].astype(compute_dtype),
                             preferred_element_type=jnp.float32)
    accv_ref[...] += jnp.dot(x, wv_ref[...].astype(compute_dtype),
                             preferred_element_type=jnp.float32)

    @pl.when(kk == pl.num_programs(2) - 1)
    def _():
        k_ref[...] = (acck_ref[...] + bk_ref[...].astype(jnp.float32)).astype(k_ref.dtype)
        v_ref[...] = (accv_ref[...] + bv_ref[...].astype(jnp.float32)).astype(v_ref.dtype)


def pallas_kv_projection(x, wk_t, wv_t, b_k, b_v, *, out_dtype=None,
                         compute_dtype=jnp.bfloat16, tm=512, tn=512, tk=None):
    """x: (M, K); wk_t, wv_t: (K, E); b_k, b_v: (E,). Returns (k, v) each (M, E)."""
    M, K = x.shape
    E = wk_t.shape[1]
    out_dtype = out_dtype or x.dtype
    if tk is None:
        tk = 1024 if np.dtype(compute_dtype).itemsize < 4 else 512
    tm = _pick_tile(M, tm, 8)
    tn = _pick_tile(E, tn, 128)
    tk = _pick_tile(K, tk, 128)
    grid = (M // tm, E // tn, K // tk)
    kern = functools.partial(_kv_linear_kernel, compute_dtype=compute_dtype)
    return pl.pallas_call(
        kern,
        out_shape=(jax.ShapeDtypeStruct((M, E), out_dtype),
                   jax.ShapeDtypeStruct((M, E), out_dtype)),
        grid=grid,
        in_specs=[
            pl.BlockSpec((tm, tk), lambda i, j, k: (i, k)),
            pl.BlockSpec((tk, tn), lambda i, j, k: (k, j)),
            pl.BlockSpec((tk, tn), lambda i, j, k: (k, j)),
            pl.BlockSpec((1, tn), lambda i, j, k: (0, j)),
            pl.BlockSpec((1, tn), lambda i, j, k: (0, j)),
        ],
        out_specs=(pl.BlockSpec((tm, tn), lambda i, j, k: (i, j)),
                   pl.BlockSpec((tm, tn), lambda i, j, k: (i, j))),
        scratch_shapes=[pltpu.VMEM((tm, tn), jnp.float32),
                        pltpu.VMEM((tm, tn), jnp.float32)],
        compiler_params=pltpu.CompilerParams(
            dimension_semantics=("parallel", "parallel", "arbitrary"),
            vmem_limit_bytes=_vmem_limit_bytes()),
    )(x, wk_t, wv_t, b_k.reshape(1, E), b_v.reshape(1, E))


# ----------------------------------------------------------------------------
# Scaled dot-product attention core on the lane-merged (L, N*nH*Hd) layout.
# Blocks are lane-dense 2-D tiles; head-batch b occupies lanes [b*Hd, (b+1)*Hd).
# ----------------------------------------------------------------------------
def _sdpa_kernel(q_ref, k_ref, v_ref, o_ref, *, head_block, head_dim, compute_dtype):
    # q_ref/o_ref: (tT, HB*Hd); k_ref/v_ref: (S, HB*Hd). Cast once, dense loads.
    q_all = q_ref[...].astype(compute_dtype)       # scale is pre-folded into W_q
    k_all = k_ref[...].astype(compute_dtype)
    v_all = v_ref[...].astype(compute_dtype)

    for b in range(head_block):                     # trace-time unroll (HB kept small)
        lo, hi = b * head_dim, (b + 1) * head_dim
        qb = q_all[:, lo:hi]                        # (tT, Hd)
        kb = k_all[:, lo:hi]                        # (S,  Hd)
        vb = v_all[:, lo:hi]                        # (S,  Hd)

        s = lax.dot_general(qb, kb, (((1,), (1,)), ((), ())),
                            preferred_element_type=jnp.float32)     # (tT, S)
        m = jnp.max(s, axis=-1, keepdims=True)
        p = jnp.exp(s - m)                                          # unnormalized
        l = jnp.sum(p, axis=-1, keepdims=True)
        ob = jnp.dot(p.astype(compute_dtype), vb,
                     preferred_element_type=jnp.float32)            # (tT, Hd)
        # Normalize the (tT, Hd) output instead of the (tT, S) probabilities.
        ob = ob * pl.reciprocal(l, approx=True)
        o_ref[:, lo:hi] = ob.astype(o_ref.dtype)


def pallas_sdpa(q2, k2, v2, *, num_heads_total, head_dim,
                compute_dtype=jnp.bfloat16, out_dtype=None,
                head_block=None, t_block=None):
    """q2: (T, BH*Hd); k2, v2: (S, BH*Hd) -> (T, BH*Hd), BH = batch*num_heads."""
    T, L = q2.shape
    S = k2.shape[0]
    BH, Hd = num_heads_total, head_dim
    assert L == BH * Hd
    out_dtype = out_dtype or q2.dtype
    HB, tT = _pick_sdpa_blocks(
        BH, T, S, Hd,
        in_bytes=np.dtype(q2.dtype).itemsize,
        out_bytes=np.dtype(out_dtype).itemsize,
        cbytes=np.dtype(compute_dtype).itemsize)
    if head_block is not None:
        HB = head_block
    if t_block is not None:
        tT = t_block
    assert BH % HB == 0 and T % tT == 0
    lane = HB * Hd
    kern = functools.partial(_sdpa_kernel, head_block=HB, head_dim=Hd,
                             compute_dtype=compute_dtype)
    return pl.pallas_call(
        kern,
        out_shape=jax.ShapeDtypeStruct((T, BH * Hd), out_dtype),
        # head axis outermost so the full-S k/v blocks are reused across T tiles
        grid=(BH // HB, T // tT),
        in_specs=[
            pl.BlockSpec((tT, lane), lambda h, t: (t, h)),
            pl.BlockSpec((S, lane), lambda h, t: (0, h)),
            pl.BlockSpec((S, lane), lambda h, t: (0, h)),
        ],
        out_specs=pl.BlockSpec((tT, lane), lambda h, t: (t, h)),
        compiler_params=pltpu.CompilerParams(
            dimension_semantics=("parallel", "parallel"),
            vmem_limit_bytes=_vmem_limit_bytes()),
    )(q2, k2, v2)


# ----------------------------------------------------------------------------
# Module wrapper (parameters + forward)
# ----------------------------------------------------------------------------
def init_attention_params(key, embed_dim, num_heads):
    assert embed_dim % num_heads == 0
    k1, k2 = jax.random.split(key, 2)
    # xavier_uniform_ on in_proj_weight (3E, E): fan_in=E, fan_out=3E
    a = math.sqrt(6.0 / (embed_dim + 3 * embed_dim))
    in_proj_weight = jax.random.uniform(
        k1, (3 * embed_dim, embed_dim), jnp.float32, -a, a)
    in_proj_bias = jnp.zeros((3 * embed_dim,), jnp.float32)
    # out_proj: torch Linear default weight init; bias zeroed in _reset_parameters
    bound = 1.0 / math.sqrt(embed_dim)
    out_proj_weight = jax.random.uniform(
        k2, (embed_dim, embed_dim), jnp.float32, -bound, bound)
    out_proj_bias = jnp.zeros((embed_dim,), jnp.float32)
    return dict(
        num_heads=num_heads,
        in_proj_weight=in_proj_weight,
        in_proj_bias=in_proj_bias,
        out_proj_weight=out_proj_weight,
        out_proj_bias=out_proj_bias,
    )


def attention_forward(params, target, source, *, compute_dtype=jnp.bfloat16):
    """target: (T, N, E), source: (S, N, E) -> (T, N, E).

    compute_dtype (default bf16) is used for all matmul operands and the HBM
    intermediates; accumulation, softmax and the final output stay f32."""
    T, N, E = target.shape
    S = source.shape[0]
    nH = params["num_heads"]
    Hd = E // nH
    scale = 1.0 / math.sqrt(E)      # torch: q / sqrt(self.kdim), kdim == embed_dim

    w = params["in_proj_weight"]    # (3E, E), packed [W_q; W_k; W_v]
    b = params["in_proj_bias"]      # (3E,)

    # One-time weight prep (small (E,E) XLA ops; cacheable at parameter-load time):
    #   * pre-transpose to (K, Nout) so kernels use the canonical (M,K)x(K,N) contraction
    #   * fold the 1/sqrt(kdim) query scaling into W_q / b_q
    wq_t = (w[:E] * scale).T
    wk_t = w[E:2 * E].T
    wv_t = w[2 * E:].T
    wo_t = params["out_proj_weight"].T
    bq = b[:E] * scale
    bk, bv = b[E:2 * E], b[2 * E:]

    inter_dtype = compute_dtype     # bf16 halves the 4 HBM round-trips of q/k/v/attn

    # _in_projection_packed: q from target, fused k/v from source (source read once).
    q = pallas_linear(target.reshape(T * N, E), wq_t, bq,
                      out_dtype=inter_dtype, compute_dtype=compute_dtype)
    k, v = pallas_kv_projection(source.reshape(S * N, E), wk_t, wv_t, bk, bv,
                                out_dtype=inter_dtype, compute_dtype=compute_dtype)

    # merge_batch_head_dim: (L*N, E) -> (L, N*nH, Hd) -> lane-merged (L, N*nH*Hd)
    # are all free row-major reshapes (E == nH*Hd, so head-batch b = n*nH + h lives
    # at lanes [b*Hd, (b+1)*Hd)).  No HBM transposes are ever materialized.
    q2 = q.reshape(T, N * E)
    k2 = k.reshape(S, N * E)
    v2 = v.reshape(S, N * E)

    attn2 = pallas_sdpa(q2, k2, v2, num_heads_total=N * nH, head_dim=Hd,
                        compute_dtype=compute_dtype, out_dtype=inter_dtype)

    # (T, N*nH*Hd) -> (T*N, E) is again a free reshape; then out_proj.
    out = pallas_linear(attn2.reshape(T * N, E), wo_t, params["out_proj_bias"],
                        out_dtype=target.dtype, compute_dtype=compute_dtype)
    return out.reshape(T, N, E)


# Pure-JAX reference mirroring the PyTorch forward (for the correctness check).
def attention_forward_ref(params, target, source):
    T, N, E = target.shape
    S = source.shape[0]
    nH = params["num_heads"]
    Hd = E // nH
    w = params["in_proj_weight"]
    b = params["in_proj_bias"]
    q = target @ w[:E].T + b[:E]
    k = source @ w[E:2 * E].T + b[E:2 * E]
    v = source @ w[2 * E:].T + b[2 * E:]
    q = q.reshape(T, N * nH, Hd).transpose(1, 0, 2)
    k = k.reshape(S, N * nH, Hd).transpose(1, 0, 2)
    v = v.reshape(S, N * nH, Hd).transpose(1, 0, 2)
    q = q / math.sqrt(E)    # torch: q / sqrt(self.kdim), kdim == embed_dim
    s = jnp.einsum("btd,bsd->bts", q, k)
    p = jax.nn.softmax(s, axis=-1)
    a = jnp.einsum("bts,bsd->btd", p, v)
    a = a.transpose(1, 0, 2).reshape(T * N, E)
    out = a @ params["out_proj_weight"].T + params["out_proj_bias"]
    return out.reshape(T, N, E)


if __name__ == "__main__":
    key = jax.random.PRNGKey(0)

    def run_case(T, S, N, E, nH, kcase):
        kp, kt, ks = jax.random.split(kcase, 3)
        params = init_attention_params(kp, embed_dim=E, num_heads=nH)
        target = jax.random.normal(kt, (T, N, E), jnp.float32)
        source = jax.random.normal(ks, (S, N, E), jnp.float32)
        ref = attention_forward_ref(params, target, source)

        # Exact-precision path (f32 operands) for the tight correctness check.
        out_f32 = jax.block_until_ready(
            attention_forward(params, target, source, compute_dtype=jnp.float32))
        assert out_f32.shape == (T, N, E)
        err = float(jnp.max(jnp.abs(out_f32 - ref)))
        assert jnp.allclose(out_f32, ref, atol=5e-3, rtol=5e-3), err

        # Default fast path (bf16 matmul operands / bf16 HBM intermediates).
        out_bf16 = jax.block_until_ready(attention_forward(params, target, source))
        assert out_bf16.shape == (T, N, E)
        err_bf = float(jnp.max(jnp.abs(out_bf16 - ref)))
        assert jnp.allclose(out_bf16, ref, atol=1e-1, rtol=1e-1), err_bf

    k1, k2 = jax.random.split(key)
    # Tiny smoke test (blocks == full dims).
    run_case(T=8, S=8, N=2, E=32, nH=4, kcase=k1)
    # Multi-step SDPA grid with lane-dense 128-multiple blocks (Hd=64, HB=4).
    run_case(T=64, S=128, N=2, E=256, nH=4, kcase=k2)
    print("KERNEL_OK")
</pallas_src>

<mosaic_0001>
module attributes {stable_mosaic.version = 11 : i64} {
  func.func @_linear_kernel(%arg0: i32, %arg1: i32, %arg2: i32, %arg3: memref<16x32xf32, #tpu.memory_space<vmem>>, %arg4: memref<32x32xf32, #tpu.memory_space<vmem>>, %arg5: memref<1x32xf32, #tpu.memory_space<vmem>>, %arg6: memref<16x32xf32, #tpu.memory_space<vmem>>, %arg7: memref<16x32xf32, #tpu.memory_space<vmem>>) attributes {dimension_semantics = [#tpu.dimension_semantics<parallel>, #tpu.dimension_semantics<parallel>, #tpu.dimension_semantics<arbitrary>], iteration_bounds = array<i64: 1, 1, 1>, scalar_prefetch = 0 : i64, scratch_operands = 1 : i64, tpu.core_type = #tpu.core_type<tc>, window_params = [{transform_indices = @transform_0, window_bounds = array<i64: 16, 32>}, {transform_indices = @transform_1, window_bounds = array<i64: 32, 32>}, {transform_indices = @transform_2, window_bounds = array<i64: 1, 32>}, {transform_indices = @transform_3, window_bounds = array<i64: 16, 32>}]} {
    %c0_i32 = arith.constant 0 : i32
    %0 = arith.cmpi eq, %arg2, %c0_i32 : i32
    %1 = arith.extui %0 : i1 to i32
    %c0_i32_0 = arith.constant 0 : i32
    %2 = arith.cmpi ne, %1, %c0_i32_0 : i32
    scf.if %2 {
      %cst_10 = arith.constant 0.000000e+00 : f32
      %12 = vector.broadcast %cst_10 : f32 to vector<16x32xf32>
      %c0_11 = arith.constant 0 : index
      %c0_12 = arith.constant 0 : index
      %13 = vector.load %arg7[%c0_11, %c0_12] : memref<16x32xf32, #tpu.memory_space<vmem>>, vector<16x32xf32>
      tpu.vector_store %arg7[%c0_11, %c0_12], %12 {strides = array<i32>} : memref<16x32xf32, #tpu.memory_space<vmem>>, vector<16x32xf32>,
    } else {
    }
    %c0 = arith.constant 0 : index
    %c0_1 = arith.constant 0 : index
    %3 = vector.load %arg7[%c0, %c0_1] : memref<16x32xf32, #tpu.memory_space<vmem>>, vector<16x32xf32>
    %c0_2 = arith.constant 0 : index
    %c0_3 = arith.constant 0 : index
    %4 = vector.load %arg3[%c0_2, %c0_3] : memref<16x32xf32, #tpu.memory_space<vmem>>, vector<16x32xf32>
    %c0_4 = arith.constant 0 : index
    %c0_5 = arith.constant 0 : index
    %5 = vector.load %arg4[%c0_4, %c0_5] : memref<32x32xf32, #tpu.memory_space<vmem>>, vector<32x32xf32>
    %cst = arith.constant dense<0.000000e+00> : vector<16x32xf32>
    %6 = tpu.matmul %4, %5, %cst {dimension_numbers = #tpu.dot_dimension_numbers<[1], [0], [0], [1], [0, 0, 1, 1], [], []>} : vector<16x32xf32>, vector<32x32xf32>, vector<16x32xf32> -> vector<16x32xf32>
    %7 = arith.addf %3, %6 : vector<16x32xf32>
    %c0_6 = arith.constant 0 : index
    %c0_7 = arith.constant 0 : index
    %8 = vector.load %arg7[%c0_6, %c0_7] : memref<16x32xf32, #tpu.memory_space<vmem>>, vector<16x32xf32>
    tpu.vector_store %arg7[%c0_6, %c0_7], %7 {strides = array<i32>} : memref<16x32xf32, #tpu.memory_space<vmem>>, vector<16x32xf32>,
    %c0_i32_8 = arith.constant 0 : i32
    %9 = arith.cmpi eq, %arg2, %c0_i32_8 : i32
    %10 = arith.extui %9 : i1 to i32
    %c0_i32_9 = arith.constant 0 : i32
    %11 = arith.cmpi ne, %10, %c0_i32_9 : i32
    scf.if %11 {
      %c0_10 = arith.constant 0 : index
      %c0_11 = arith.constant 0 : index
      %12 = vector.load %arg7[%c0_10, %c0_11] : memref<16x32xf32, #tpu.memory_space<vmem>>, vector<16x32xf32>
      %c0_12 = arith.constant 0 : index
      %c0_13 = arith.constant 0 : index
      %13 = vector.load %arg5[%c0_12, %c0_13] : memref<1x32xf32, #tpu.memory_space<vmem>>, vector<1x32xf32>
      %14 = vector.broadcast %13 : vector<1x32xf32> to vector<16x32xf32>
      %15 = arith.addf %12, %14 : vector<16x32xf32>
      %c0_14 = arith.constant 0 : index
      %c0_15 = arith.constant 0 : index
      %16 = vector.load %arg6[%c0_14, %c0_15] : memref<16x32xf32, #tpu.memory_space<vmem>>, vector<16x32xf32>
      tpu.vector_store %arg6[%c0_14, %c0_15], %15 {strides = array<i32>} : memref<16x32xf32, #tpu.memory_space<vmem>>, vector<16x32xf32>,
    } else {
    }
    return
  }
  func.func @transform_0(%arg0: i32, %arg1: i32, %arg2: i32) -> (i32, i32) {
    %c0_i32 = arith.constant 0 : i32
    return %arg0, %arg2 : i32, i32
  }
  func.func @transform_1(%arg0: i32, %arg1: i32, %arg2: i32) -> (i32, i32) {
    %c0_i32 = arith.constant 0 : i32
    return %arg2, %arg1 : i32, i32
  }
  func.func @transform_2(%arg0: i32, %arg1: i32, %arg2: i32) -> (i32, i32) {
    %c0_i32 = arith.constant 0 : i32
    %c0_i32_0 = arith.constant 0 : i32
    return %c0_i32, %arg1 : i32, i32
  }
  func.func @transform_3(%arg0: i32, %arg1: i32, %arg2: i32) -> (i32, i32) {
    %c0_i32 = arith.constant 0 : i32
    return %arg0, %arg1 : i32, i32
  }
}

</mosaic_0001>

<bundles_post_ra>
// kernel: tpu_custom_call.1
= control target key start
LH: loop header
LB: loop body
LE: loop exit
PB: predicated region body
PF: predicated region fallthrough
CT: control target
= control target key end

     0   :  { %8 = vsyncpa [#allocation4], 0  ;;  %s275_s0 = inlined_call_operand.hbm [shape: f32[16,32], index: 0, kind: input, shape index: {}]   ;;  %s276_s1 = inlined_call_operand.hbm [shape: f32[32,32], index: 1, kind: input, shape index: {}]   ;;  %s277_s2 = inlined_call_operand.vmem [shape: f32[1,32], index: 2, kind: input, shape index: {}]   ;;  %s278_s3 = inlined_call_operand.hbm [shape: f32[16,32], index: 3, kind: output, shape index: {}]  }
   0x1   :  { %9 = vsyncpa [#allocation7], 0 }
   0x2   :  { %10 = vsyncpa [#allocation5], 0  ;;  %s15_s14 = sshll.u32 %s275_s0, 4  ;;  %s220_s15 = smov [#allocation3]   ;;  %s16_s14 = int_to_ptr.hbm [resolvable:$true] %s15_s14 }
   0x3   :  { %s17_s16 = sshll.u32 %s220_s15, 4  ;;  %s28_s19 = sshll.u32 %s276_s1, 4  ;;  %s18_s16 = int_to_ptr.vmem [resolvable:$true] %s17_s16  ;;  %s29_s19 = int_to_ptr.hbm [resolvable:$true] %s28_s19 }
   0x4   :  { %s221_s20 = smov 128   ;;  %s222_s21 = smov 8  }
   0x5   :  { %23 = dma.hbm_to_vmem [thread:$0]  %s16_s14, 256, %s18_s16, [#allocation4], %s221_s20, %s221_s20, %s222_s21  }
   0x6   :  { %s223_s22 = smov [#allocation6]  }
   0x7   :  { %s30_s23 = sshll.u32 %s223_s22, 4  ;;  %s31_s23 = int_to_ptr.vmem [resolvable:$true] %s30_s23 }
   0x8   :  { %36 = dma.hbm_to_vmem [thread:$0]  %s29_s19, 512, %s31_s23, [#allocation7], %s221_s20, %s221_s20, %s222_s21  }
   0x9   :  { %214 = dma.done.wait [#allocation4], 256  }
   0xa   :  { %215 = vsyncadd [#allocation4], 4294967040 }
   0xb   :  { %216 = dma.done.wait [#allocation7], 512  }
   0xc   :  { %217 = vsyncadd [#allocation7], 4294966784  ;;  %vm51_vm0 = vcmask 261120   ;;  %v224_v0 = vmov 0.0   ;;  %v61_v1 = vld [vmem:[#allocation6 + $0x18] sm:$0xff]  ;;  %v60_v2 = vld [vmem:[#allocation6 + $0x10] sm:$0xff] }
   0xd   :  { %52 = vst.msk [vmem:[#allocation2] sm:$0xff] %vm51_vm0, %v224_v0  ;;  %81 = vmatpush.msra.mxu0 %v61_v1  ;;  %131 = vmatpush.msra.mxu1 %v61_v1  ;;  %v59_v3 = vld [vmem:[#allocation6 + $0x8] sm:$0xff]  ;;  %v58_v4 = vld [vmem:[#allocation6] sm:$0xff]  ;;  %v56_v5 = vld [vmem:[#allocation3] sm:$0xff]  ;;  %s225_s24 = smov [#allocation8]   ;;  %s115_s28 = sshll.u32 %s278_s3, 4  ;;  %s116_s28 = int_to_ptr.hbm [resolvable:$true] %s115_s28 }
   0xe   :  { %53 = vst.msk [vmem:[#allocation2 + $0x8] sm:$0xff] %vm51_vm0, %v224_v0  ;;  %v57_v6 = vld [vmem:[#allocation3 + $0x8] sm:$0xff]  ;;  %v141_v13 = vld [vmem:[%s277_s2] ss:$0 sm:$0xff]  ;;  %s113_s25 = sshll.u32 %s225_s24, 4  ;;  %s114_s25 = int_to_ptr.vmem [resolvable:$true] %s113_s25 }
   0xf   :  { %82 = vmatpush.msra.mxu0 %v60_v2  ;;  %132 = vmatpush.msra.mxu1 %v60_v2 }
  0x11   :  { %83 = vmatpush.msra.mxu0 %v59_v3  ;;  %133 = vmatpush.msra.mxu1 %v59_v3 }
  0x13   :  { %84 = vmatpush.msra.mxu0 %v58_v4  ;;  %134 = vmatpush.msra.mxu1 %v58_v4 }
  0x14   :  { %129 = vmatmul.msk.f32.vlgmr.msra.gmra.mxu0 %vm51_vm0, %v56_v5  ;;  %130 = vmatmul.msk.f32.vlgmr.msra.gmra.mxu1 %vm51_vm0, %v57_v6  ;;  %v54_v7 = vld [vmem:[#allocation2] sm:$0xff] }
  0x15   :  { %v55_v8 = vld [vmem:[#allocation2 + $0x8] sm:$0xff] }
  0x91   :  { %v86_v9 = vpop.f32.mrf.mxu0  ;;  %v89_v10 = vpop.f32.mrf.mxu1 }
  0x92   :  { %v92_v11 = vadd.f32 %v86_v9, %v54_v7  ;;  %v93_v12 = vadd.f32 %v89_v10, %v55_v8 }
  0x94   :  { %94 = vst.msk [vmem:[#allocation2] sm:$0xff] %vm51_vm0, %v92_v11 }
  0x95   :  { %95 = vst.msk [vmem:[#allocation2 + $0x8] sm:$0xff] %vm51_vm0, %v93_v12 }
  0x9b   :  { %v99_v14 = vld [vmem:[#allocation2] sm:$0xff] }
  0x9c   :  { %v100_v15 = vld [vmem:[#allocation2 + $0x8] sm:$0xff]  ;;  %v105_v16 = vadd.f32 %v141_v13, %v99_v14 }
  0x9d   :  { %v106_v17 = vadd.f32 %v141_v13, %v100_v15 }
  0x9e   :  { %107 = vst.msk [vmem:[#allocation8] sm:$0xff] %vm51_vm0, %v105_v16 }
  0x9f   :  { %108 = vst.msk [vmem:[#allocation8 + $0x8] sm:$0xff] %vm51_vm0, %v106_v17 }
  0xa0   :  { %121 = dma.vmem_to_hbm [thread:$0]  %s114_s25, 256, %s116_s28, [#allocation5], %s221_s20, %s221_s20, %s222_s21  }
  0xa1   :  { %218 = dma.done.wait [#allocation5], 256  }
  0xa2   :  { %219 = vsyncadd [#allocation5], 4294967040 }
  0xa3   :  { %126 = vsyncpa [#allocation4], 1 }
  0xa4   :  { %127 = vsyncpa [#allocation7], 1 }
  0xa5   :  { %128 = vsyncpa [#allocation5], 1 }

</bundles_post_ra>
